<compile_context>
chip_gen: v5e
topology: v5e:2x2
jax: 0.10.0
libtpu: 0.0.40
codegen_flags: <defaults>
</compile_context>

<pallas_src>
import functools
import math

import jax
import jax.numpy as jnp
from jax.experimental import pallas as pl
from jax.experimental.pallas import tpu as pltpu


def _round_up(n, m):
    return ((n + m - 1) // m) * m


def _sublane(dtype):
    # rows per vreg sublane tile: 8 for 32-bit, 16 for bf16, 32 for 8-bit
    return 8 * max(1, 4 // jnp.dtype(dtype).itemsize)


def mlp_blackbox_kernel(x_ref, w1_ref, b1_ref, w2_ref, b2_ref, w3_ref, b3_ref,
                        o_ref, *, compute_dtype):
    # x streams in its HBM dtype; cast (if any) happens in VMEM, not as an
    # extra wrapper-side HBM pass.  No-op when compute_dtype == x dtype.
    x = x_ref[...].astype(compute_dtype)                        # (TB, P*dim_in)

    # fc1 + ReLU (accumulate in f32; bias/ReLU in f32 -> VPU-friendly on v5e)
    h1 = jnp.dot(x, w1_ref[...], preferred_element_type=jnp.float32)
    h1 = jnp.maximum(h1 + b1_ref[...], 0.0)                     # (TB, P*64) f32

    # fc2 + ReLU
    h2 = jnp.dot(h1.astype(compute_dtype), w2_ref[...],
                 preferred_element_type=jnp.float32)
    h2 = jnp.maximum(h2 + b2_ref[...], 0.0)                     # (TB, P*32) f32

    # fc3 (logits, no activation)
    out = jnp.dot(h2.astype(compute_dtype), w3_ref[...],
                  preferred_element_type=jnp.float32)
    o_ref[...] = (out + b3_ref[...]).astype(o_ref.dtype)        # (TB, P*2)


def mlp_blackbox_forward(x, params, *, compute_dtype=jnp.float32,
                         block_rows=8192, pack=4):
    """Forward pass of MLP_BLACKBOX.

    x: any shape whose trailing dims flatten to dim_in (mirrors x.view(-1, dim_in)).
    params: dict with w1 (dim_in,64), b1 (1,64), w2 (64,32), b2 (1,32),
            w3 (32,2), b3 (1,2)  (weights stored as (in, out), i.e. W = W_pt.T).
    compute_dtype: dtype of the MXU inputs.  float32 matches PyTorch semantics;
            bfloat16 quantizes x/weights at the MXU inputs only (accumulation,
            bias add and ReLU stay f32), so results differ at bf16 precision.
    block_rows: target logical rows per grid step.
    pack: lane-pack factor (4 packs dim_in=32 rows densely into 128 lanes).
    """
    dim_in = params["w1"].shape[0]
    x2d = x.reshape(-1, dim_in)                                 # x.view(-1, dim_in)
    B = x2d.shape[0]

    P = pack
    # Pad only to a multiple of the pack factor (rare, tiny) so the lane-pack
    # reshape is legal.  No padding to tile multiples: Pallas masks the ragged
    # last grid block itself.
    Bp = _round_up(B, P)
    if Bp != B:
        x2d = jnp.pad(x2d, ((0, Bp - B), (0, 0)))
    n_packed = Bp // P
    xp = x2d.reshape(n_packed, P * dim_in)                      # free reshape

    # Block-diagonal packed weights (tiny: ~260 KB f32 total).  Zero blocks
    # contribute exact 0.0, so per-logical-row math is unchanged.
    eye = jnp.eye(P, dtype=jnp.float32)
    w1 = jnp.kron(eye, params["w1"].astype(jnp.float32)).astype(compute_dtype)
    w2 = jnp.kron(eye, params["w2"].astype(jnp.float32)).astype(compute_dtype)
    w3 = jnp.kron(eye, params["w3"].astype(jnp.float32)).astype(compute_dtype)
    b1 = jnp.tile(params["b1"].astype(jnp.float32), (1, P))
    b2 = jnp.tile(params["b2"].astype(jnp.float32), (1, P))
    b3 = jnp.tile(params["b3"].astype(jnp.float32), (1, P))

    # Batch tile in *packed* rows, rounded to the sublane multiple of the
    # widest-packing dtype involved (8 for f32, 16 for bf16).
    sub = max(_sublane(x2d.dtype), _sublane(compute_dtype))
    tb_target = _round_up(max(block_rows // P, 1), sub)
    if tb_target >= n_packed:
        if n_packed > 2 * sub:
            # Split into >=2 tiles so v7x's two TensorCores both get work.
            TB = _round_up(pl.cdiv(n_packed, 2), sub)
        else:
            # Single block covering the full array (block dims == array dims
            # is always a legal tiling, even below the sublane multiple).
            TB = n_packed
    else:
        TB = tb_target
    grid = (pl.cdiv(n_packed, TB),)

    kin = P * dim_in
    nout = P * 2
    const = lambda i: (0, 0)                                    # VMEM-resident params

    out = pl.pallas_call(
        functools.partial(mlp_blackbox_kernel, compute_dtype=compute_dtype),
        out_shape=jax.ShapeDtypeStruct((n_packed, nout), jnp.float32),
        grid=grid,
        in_specs=[
            pl.BlockSpec((TB, kin), lambda i: (i, 0)),          # x: tiled over batch
            pl.BlockSpec(w1.shape, const),
            pl.BlockSpec(b1.shape, const),
            pl.BlockSpec(w2.shape, const),
            pl.BlockSpec(b2.shape, const),
            pl.BlockSpec(w3.shape, const),
            pl.BlockSpec(b3.shape, const),
        ],
        out_specs=pl.BlockSpec((TB, nout), lambda i: (i, 0)),
        compiler_params=pltpu.CompilerParams(
            dimension_semantics=("parallel",)),                 # megacore on v7x
    )(xp, w1, b1, w2, b2, w3, b3)

    # Unpack (n_packed, P*2) -> (Bp, 2) is a free row-major reshape; the [:B]
    # slice touches only the tiny logits array.
    return out.reshape(Bp, 2)[:B]


def init_params(key, dim_in):
    """Deterministic init mimicking nn.Linear's default U(-1/sqrt(fan_in), ...)."""
    def linear(key, fan_in, fan_out):
        kw, kb = jax.random.split(key)
        bound = 1.0 / math.sqrt(fan_in)
        # stored as (in, out) so the kernel computes x @ W  (== F.linear with W.T)
        w = jax.random.uniform(kw, (fan_in, fan_out), jnp.float32, -bound, bound)
        b = jax.random.uniform(kb, (1, fan_out), jnp.float32, -bound, bound)
        return w, b

    k1, k2, k3 = jax.random.split(key, 3)
    w1, b1 = linear(k1, dim_in, 64)
    w2, b2 = linear(k2, 64, 32)
    w3, b3 = linear(k3, 32, 2)
    return {"w1": w1, "b1": b1, "w2": w2, "b2": b2, "w3": w3, "b3": b3}


def _reference(x2d, params):
    h = jnp.maximum(x2d @ params["w1"] + params["b1"], 0.0)
    h = jnp.maximum(h @ params["w2"] + params["b2"], 0.0)
    return h @ params["w3"] + params["b3"]


if __name__ == "__main__":
    key = jax.random.PRNGKey(0)
    dim_in = 32          # black-box attack feature width (posterior vector)
    batch = 8

    k_params, k_x, k_x2 = jax.random.split(key, 3)
    params = init_params(k_params, dim_in)

    # --- small batch, f32 (PyTorch semantics), single full block -------------
    x = jax.random.normal(k_x, (batch, dim_in), jnp.float32)
    out = mlp_blackbox_forward(x, params)
    jax.block_until_ready(out)
    ref = _reference(x.reshape(-1, dim_in), params)
    assert out.shape == (batch, 2)
    assert jnp.allclose(out, ref, atol=1e-4, rtol=1e-4)

    # --- batch not divisible by 4 or the tile: exercises pack-pad + ragged
    #     last grid block + multi-tile pipeline ---------------------------------
    x_big = jax.random.normal(k_x2, (102, dim_in), jnp.float32)
    out_big = mlp_blackbox_forward(x_big, params, block_rows=32)
    jax.block_until_ready(out_big)
    ref_big = _reference(x_big, params)
    assert out_big.shape == (102, 2)
    assert jnp.allclose(out_big, ref_big, atol=1e-4, rtol=1e-4)

    # --- bf16 MXU-input variant (cast happens inside the kernel; x streams f32)
    out_bf16 = mlp_blackbox_forward(x_big, params, compute_dtype=jnp.bfloat16,
                                    block_rows=64)
    jax.block_until_ready(out_bf16)
    assert out_bf16.shape == (102, 2)
    assert jnp.allclose(out_bf16, ref_big, atol=5e-2, rtol=5e-2)

    print("KERNEL_OK")
</pallas_src>

<mosaic_0001>
module attributes {stable_mosaic.version = 11 : i64} {
  func.func @mlp_blackbox_kernel(%arg0: i32, %arg1: memref<2x128xf32, #tpu.memory_space<vmem>>, %arg2: memref<128x256xf32, #tpu.memory_space<vmem>>, %arg3: memref<1x256xf32, #tpu.memory_space<vmem>>, %arg4: memref<256x128xf32, #tpu.memory_space<vmem>>, %arg5: memref<1x128xf32, #tpu.memory_space<vmem>>, %arg6: memref<128x8xf32, #tpu.memory_space<vmem>>, %arg7: memref<1x8xf32, #tpu.memory_space<vmem>>, %arg8: memref<2x8xf32, #tpu.memory_space<vmem>>) attributes {dimension_semantics = [#tpu.dimension_semantics<parallel>], iteration_bounds = array<i64: 1>, scalar_prefetch = 0 : i64, scratch_operands = 0 : i64, tpu.core_type = #tpu.core_type<tc>, window_params = [{transform_indices = @transform_0, window_bounds = array<i64: 2, 128>}, {pipeline_mode = #tpu.pipeline_mode<synchronous>, transform_indices = @transform_1, window_bounds = array<i64: 128, 256>}, {pipeline_mode = #tpu.pipeline_mode<synchronous>, transform_indices = @transform_2, window_bounds = array<i64: 1, 256>}, {pipeline_mode = #tpu.pipeline_mode<synchronous>, transform_indices = @transform_3, window_bounds = array<i64: 256, 128>}, {pipeline_mode = #tpu.pipeline_mode<synchronous>, transform_indices = @transform_4, window_bounds = array<i64: 1, 128>}, {pipeline_mode = #tpu.pipeline_mode<synchronous>, transform_indices = @transform_5, window_bounds = array<i64: 128, 8>}, {pipeline_mode = #tpu.pipeline_mode<synchronous>, transform_indices = @transform_6, window_bounds = array<i64: 1, 8>}, {transform_indices = @transform_7, window_bounds = array<i64: 2, 8>}]} {
    %c0 = arith.constant 0 : index
    %c0_0 = arith.constant 0 : index
    %0 = vector.load %arg1[%c0, %c0_0] : memref<2x128xf32, #tpu.memory_space<vmem>>, vector<2x128xf32>
    %c0_1 = arith.constant 0 : index
    %c0_2 = arith.constant 0 : index
    %1 = vector.load %arg2[%c0_1, %c0_2] : memref<128x256xf32, #tpu.memory_space<vmem>>, vector<128x256xf32>
    %cst = arith.constant dense<0.000000e+00> : vector<2x256xf32>
    %2 = tpu.matmul %0, %1, %cst {dimension_numbers = #tpu.dot_dimension_numbers<[1], [0], [0], [1], [0, 0, 1, 1], [], []>} : vector<2x128xf32>, vector<128x256xf32>, vector<2x256xf32> -> vector<2x256xf32>
    %c0_3 = arith.constant 0 : index
    %c0_4 = arith.constant 0 : index
    %3 = vector.load %arg3[%c0_3, %c0_4] : memref<1x256xf32, #tpu.memory_space<vmem>>, vector<1x256xf32>
    %4 = vector.broadcast %3 : vector<1x256xf32> to vector<2x256xf32>
    %5 = arith.addf %2, %4 : vector<2x256xf32>
    %cst_5 = arith.constant 0.000000e+00 : f32
    %6 = vector.broadcast %cst_5 : f32 to vector<2x256xf32>
    %7 = arith.maximumf %5, %6 : vector<2x256xf32>
    %c0_6 = arith.constant 0 : index
    %c0_7 = arith.constant 0 : index
    %8 = vector.load %arg4[%c0_6, %c0_7] : memref<256x128xf32, #tpu.memory_space<vmem>>, vector<256x128xf32>
    %cst_8 = arith.constant dense<0.000000e+00> : vector<2x128xf32>
    %9 = tpu.matmul %7, %8, %cst_8 {dimension_numbers = #tpu.dot_dimension_numbers<[1], [0], [0], [1], [0, 0, 1, 1], [], []>} : vector<2x256xf32>, vector<256x128xf32>, vector<2x128xf32> -> vector<2x128xf32>
    %c0_9 = arith.constant 0 : index
    %c0_10 = arith.constant 0 : index
    %10 = vector.load %arg5[%c0_9, %c0_10] : memref<1x128xf32, #tpu.memory_space<vmem>>, vector<1x128xf32>
    %11 = vector.broadcast %10 : vector<1x128xf32> to vector<2x128xf32>
    %12 = arith.addf %9, %11 : vector<2x128xf32>
    %cst_11 = arith.constant 0.000000e+00 : f32
    %13 = vector.broadcast %cst_11 : f32 to vector<2x128xf32>
    %14 = arith.maximumf %12, %13 : vector<2x128xf32>
    %c0_12 = arith.constant 0 : index
    %c0_13 = arith.constant 0 : index
    %15 = vector.load %arg6[%c0_12, %c0_13] : memref<128x8xf32, #tpu.memory_space<vmem>>, vector<128x8xf32>
    %cst_14 = arith.constant dense<0.000000e+00> : vector<2x8xf32>
    %16 = tpu.matmul %14, %15, %cst_14 {dimension_numbers = #tpu.dot_dimension_numbers<[1], [0], [0], [1], [0, 0, 1, 1], [], []>} : vector<2x128xf32>, vector<128x8xf32>, vector<2x8xf32> -> vector<2x8xf32>
    %c0_15 = arith.constant 0 : index
    %c0_16 = arith.constant 0 : index
    %17 = vector.load %arg7[%c0_15, %c0_16] : memref<1x8xf32, #tpu.memory_space<vmem>>, vector<1x8xf32>
    %18 = vector.broadcast %17 : vector<1x8xf32> to vector<2x8xf32>
    %19 = arith.addf %16, %18 : vector<2x8xf32>
    %c0_17 = arith.constant 0 : index
    %c0_18 = arith.constant 0 : index
    %20 = vector.load %arg8[%c0_17, %c0_18] : memref<2x8xf32, #tpu.memory_space<vmem>>, vector<2x8xf32>
    tpu.vector_store %arg8[%c0_17, %c0_18], %19 {strides = array<i32>} : memref<2x8xf32, #tpu.memory_space<vmem>>, vector<2x8xf32>,
    return
  }
  func.func @transform_0(%arg0: i32) -> (i32, i32) {
    %c0_i32 = arith.constant 0 : i32
    %c0_i32_0 = arith.constant 0 : i32
    return %arg0, %c0_i32 : i32, i32
  }
  func.func @transform_1(%arg0: i32) -> (i32, i32) {
    %c0_i32 = arith.constant 0 : i32
    %c0_i32_0 = arith.constant 0 : i32
    %c0_i32_1 = arith.constant 0 : i32
    return %c0_i32, %c0_i32_0 : i32, i32
  }
  func.func @transform_2(%arg0: i32) -> (i32, i32) {
    %c0_i32 = arith.constant 0 : i32
    %c0_i32_0 = arith.constant 0 : i32
    %c0_i32_1 = arith.constant 0 : i32
    return %c0_i32, %c0_i32_0 : i32, i32
  }
  func.func @transform_3(%arg0: i32) -> (i32, i32) {
    %c0_i32 = arith.constant 0 : i32
    %c0_i32_0 = arith.constant 0 : i32
    %c0_i32_1 = arith.constant 0 : i32
    return %c0_i32, %c0_i32_0 : i32, i32
  }
  func.func @transform_4(%arg0: i32) -> (i32, i32) {
    %c0_i32 = arith.constant 0 : i32
    %c0_i32_0 = arith.constant 0 : i32
    %c0_i32_1 = arith.constant 0 : i32
    return %c0_i32, %c0_i32_0 : i32, i32
  }
  func.func @transform_5(%arg0: i32) -> (i32, i32) {
    %c0_i32 = arith.constant 0 : i32
    %c0_i32_0 = arith.constant 0 : i32
    %c0_i32_1 = arith.constant 0 : i32
    return %c0_i32, %c0_i32_0 : i32, i32
  }
  func.func @transform_6(%arg0: i32) -> (i32, i32) {
    %c0_i32 = arith.constant 0 : i32
    %c0_i32_0 = arith.constant 0 : i32
    %c0_i32_1 = arith.constant 0 : i32
    return %c0_i32, %c0_i32_0 : i32, i32
  }
  func.func @transform_7(%arg0: i32) -> (i32, i32) {
    %c0_i32 = arith.constant 0 : i32
    %c0_i32_0 = arith.constant 0 : i32
    return %arg0, %c0_i32 : i32, i32
  }
}

</mosaic_0001>

<bundles_post_ra>
// kernel: tpu_custom_call.1
= control target key start
LH: loop header
LB: loop body
LE: loop exit
PB: predicated region body
PF: predicated region fallthrough
CT: control target
= control target key end

     0   :  { %12 = vsyncpa [#allocation3], 0  ;;  %s480_s0 = inlined_call_operand.vmem [shape: f32[2,128], index: 0, kind: input, shape index: {}]   ;;  %s481_s1 = inlined_call_operand.hbm [shape: f32[128,256], index: 1, kind: input, shape index: {}]   ;;  %s482_s2 = inlined_call_operand.vmem [shape: f32[1,256], index: 2, kind: input, shape index: {}]   ;;  %s483_s3 = inlined_call_operand.hbm [shape: f32[256,128], index: 3, kind: input, shape index: {}]   ;;  %s484_s4 = inlined_call_operand.vmem [shape: f32[1,128], index: 4, kind: input, shape index: {}]   ;;  %s485_s5 = inlined_call_operand.vmem [shape: f32[128,8], index: 5, kind: input, shape index: {}]   ;;  %s486_s6 = inlined_call_operand.vmem [shape: f32[1,8], index: 6, kind: input, shape index: {}]   ;;  %s487_s7 = inlined_call_operand.hbm [shape: f32[2,8], index: 7, kind: output, shape index: {}]  }
   0x1   :  { %13 = vsyncpa [#allocation6], 0 }
   0x2   :  { %14 = vsyncpa [#allocation4], 0  ;;  %s21_s26 = sshll.u32 %s481_s1, 4  ;;  %s364_s27 = smov [#allocation2]   ;;  %s22_s26 = int_to_ptr.hbm [resolvable:$true] %s21_s26 }
   0x3   :  { %s23_s28 = sshll.u32 %s364_s27, 4  ;;  %s36_s8 = sshll.u32 %s483_s3, 4  ;;  %s24_s28 = int_to_ptr.vmem [resolvable:$true] %s23_s28  ;;  %s37_s8 = int_to_ptr.hbm [resolvable:$true] %s36_s8 }
   0x4   :  { %s365_s9 = smov 256   ;;  %s366_s10 = smov 16  }
   0x5   :  { %29 = dma.hbm_to_vmem [thread:$0]  %s22_s26, 4096, %s24_s28, [#allocation3], %s365_s9, %s365_s9, %s366_s10  }
   0x6   :  { %s367_s11 = smov [#allocation5]   ;;  %s368_s13 = smov 128  }
   0x7   :  { %s38_s12 = sshll.u32 %s367_s11, 4  ;;  %s369_s14 = smov 8   ;;  %s39_s12 = int_to_ptr.vmem [resolvable:$true] %s38_s12 }
   0x8   :  { %44 = dma.hbm_to_vmem [thread:$0]  %s37_s8, 4096, %s39_s12, [#allocation6], %s368_s13, %s368_s13, %s369_s14  }
   0x9   :  { %358 = dma.done.wait [#allocation3], 4096  }
   0xa   :  { %359 = vsyncadd [#allocation3], 4294963200 }
   0xb   :  { %360 = dma.done.wait [#allocation6], 4096  }
   0xc   :  { %361 = vsyncadd [#allocation6], 4294963200  ;;  %v90_v0 = vld [vmem:[#allocation2 + $0xf0] sm:$0xff]  ;;  %v88_v1 = vld [vmem:[#allocation2 + $0xe0] sm:$0xff]  ;;  %s370_s25 = smov [#allocation7]   ;;  %vm257_vm0 = vcmask 58368  }
   0xd   :  { %v91_v2 = vld [vmem:[#allocation2 + $0xf8] sm:$0xff]  ;;  %98 = vmatpush.msra.mxu0 %v90_v0  ;;  %v89_v3 = vld [vmem:[#allocation2 + $0xe8] sm:$0xff]  ;;  %v86_v4 = vld [vmem:[#allocation2 + $0xd0] sm:$0xff]  ;;  %s264_s26 = sshll.u32 %s370_s25, 4  ;;  %s265_s26 = int_to_ptr.vmem [resolvable:$true] %s264_s26 }
   0xe   :  { %118 = vmatpush.msra.mxu1 %v91_v2  ;;  %v87_v5 = vld [vmem:[#allocation2 + $0xd8] sm:$0xff]  ;;  %v84_v6 = vld [vmem:[#allocation2 + $0xc0] sm:$0xff]  ;;  %v85_v7 = vld [vmem:[#allocation2 + $0xc8] sm:$0xff] }
   0xf   :  { %99 = vmatpush.msra.mxu0 %v88_v1  ;;  %v82_v8 = vld [vmem:[#allocation2 + $0xb0] sm:$0xff]  ;;  %v83_v9 = vld [vmem:[#allocation2 + $0xb8] sm:$0xff]  ;;  %v80_v10 = vld [vmem:[#allocation2 + $0xa0] sm:$0xff] }
  0x10   :  { %119 = vmatpush.msra.mxu1 %v89_v3  ;;  %v81_v11 = vld [vmem:[#allocation2 + $0xa8] sm:$0xff]  ;;  %v78_v12 = vld [vmem:[#allocation2 + $0x90] sm:$0xff]  ;;  %v79_v13 = vld [vmem:[#allocation2 + $0x98] sm:$0xff] }
  0x11   :  { %100 = vmatpush.msra.mxu0 %v86_v4  ;;  %v155_v14 = vld [vmem:[#allocation5 + $0x78] sm:$0xff]  ;;  %v154_v15 = vld [vmem:[#allocation5 + $0x70] sm:$0xff]  ;;  %v76_v17 = vld [vmem:[#allocation2 + $0x80] sm:$0xff] }
  0x12   :  { %120 = vmatpush.msra.mxu1 %v87_v5  ;;  %v171_v16 = vld [vmem:[#allocation5 + $0xf8] sm:$0xff]  ;;  %v77_v18 = vld [vmem:[#allocation2 + $0x88] sm:$0xff]  ;;  %176 = vmatpush.msra.mxu2 %v155_v14  ;;  %v170_v19 = vld [vmem:[#allocation5 + $0xf0] sm:$0xff] }
  0x13   :  { %101 = vmatpush.msra.mxu0 %v84_v6  ;;  %196 = vmatpush.msra.mxu3 %v171_v16  ;;  %v153_v20 = vld [vmem:[#allocation5 + $0x68] sm:$0xff]  ;;  %v74_v22 = vld [vmem:[#allocation2 + $0x70] sm:$0xff]  ;;  %v75_v23 = vld [vmem:[#allocation2 + $0x78] sm:$0xff] }
  0x14   :  { %121 = vmatpush.msra.mxu1 %v85_v7  ;;  %v169_v21 = vld [vmem:[#allocation5 + $0xe8] sm:$0xff]  ;;  %177 = vmatpush.msra.mxu2 %v154_v15  ;;  %v152_v24 = vld [vmem:[#allocation5 + $0x60] sm:$0xff]  ;;  %v151_v28 = vld [vmem:[#allocation5 + $0x58] sm:$0xff] }
  0x15   :  { %102 = vmatpush.msra.mxu0 %v82_v8  ;;  %197 = vmatpush.msra.mxu3 %v170_v19  ;;  %v168_v25 = vld [vmem:[#allocation5 + $0xe0] sm:$0xff]  ;;  %v73_v27 = vld [vmem:[#allocation2 + $0x68] sm:$0xff]  ;;  %v167_v29 = vld [vmem:[#allocation5 + $0xd8] sm:$0xff] }
  0x16   :  { %122 = vmatpush.msra.mxu1 %v83_v9  ;;  %v72_v26 = vld [vmem:[#allocation2 + $0x60] sm:$0xff]  ;;  %178 = vmatpush.msra.mxu2 %v153_v20  ;;  %v70_v30 = vld [vmem:[#allocation2 + $0x50] sm:$0xff]  ;;  %v71_v31 = vld [vmem:[#allocation2 + $0x58] sm:$0xff] }
  0x17   :  { %103 = vmatpush.msra.mxu0 %v80_v10  ;;  %198 = vmatpush.msra.mxu3 %v169_v21  ;;  %v150_v32 = vld [vmem:[#allocation5 + $0x50] sm:$0xff]  ;;  %v68_v34 = vld [vmem:[#allocation2 + $0x40] sm:$0xff]  ;;  %v69_v35 = vld [vmem:[#allocation2 + $0x48] sm:$0xff] }
  0x18   :  { %123 = vmatpush.msra.mxu1 %v81_v11  ;;  %179 = vmatpush.msra.mxu2 %v152_v24  ;;  %v166_v33 = vld [vmem:[#allocation5 + $0xd0] sm:$0xff]  ;;  %v149_v36 = vld [vmem:[#allocation5 + $0x48] sm:$0xff]  ;;  %v67_v39 = vld [vmem:[#allocation2 + $0x38] sm:$0xff] }
  0x19   :  { %104 = vmatpush.msra.mxu0 %v78_v12  ;;  %199 = vmatpush.msra.mxu3 %v168_v25  ;;  %v165_v37 = vld [vmem:[#allocation5 + $0xc8] sm:$0xff]  ;;  %v66_v38 = vld [vmem:[#allocation2 + $0x30] sm:$0xff]  ;;  %v148_v40 = vld [vmem:[#allocation5 + $0x40] sm:$0xff] }
  0x1a   :  { %124 = vmatpush.msra.mxu1 %v79_v13  ;;  %180 = vmatpush.msra.mxu2 %v151_v28  ;;  %v164_v41 = vld [vmem:[#allocation5 + $0xc0] sm:$0xff]  ;;  %v65_v43 = vld [vmem:[#allocation2 + $0x28] sm:$0xff]  ;;  %v147_v44 = vld [vmem:[#allocation5 + $0x38] sm:$0xff] }
  0x1b   :  { %105 = vmatpush.msra.mxu0 %v76_v17  ;;  %200 = vmatpush.msra.mxu3 %v167_v29  ;;  %v64_v42 = vld [vmem:[#allocation2 + $0x20] sm:$0xff]  ;;  %v163_v45 = vld [vmem:[#allocation5 + $0xb8] sm:$0xff]  ;;  %v62_v46 = vld [vmem:[#allocation2 + $0x10] sm:$0xff] }
  0x1c   :  { %125 = vmatpush.msra.mxu1 %v77_v18  ;;  %181 = vmatpush.msra.mxu2 %v150_v32  ;;  %v63_v47 = vld [vmem:[#allocation2 + $0x18] sm:$0xff]  ;;  %v146_v48 = vld [vmem:[#allocation5 + $0x30] sm:$0xff]  ;;  %v60_v50 = vld [vmem:[#allocation2] sm:$0xff] }
  0x1d   :  { %106 = vmatpush.msra.mxu0 %v74_v22  ;;  %201 = vmatpush.msra.mxu3 %v166_v33  ;;  %v162_v49 = vld [vmem:[#allocation5 + $0xb0] sm:$0xff]  ;;  %v61_v51 = vld [vmem:[#allocation2 + $0x8] sm:$0xff]  ;;  %v59_v52 = vld [vmem:[%s480_s0] sm:$0x3] }
  0x1e   :  { %126 = vmatpush.msra.mxu1 %v75_v23  ;;  %182 = vmatpush.msra.mxu2 %v149_v36  ;;  %v145_v53 = vld [vmem:[#allocation5 + $0x28] sm:$0xff]  ;;  %v144_v55 = vld [vmem:[#allocation5 + $0x20] sm:$0xff]  ;;  %v143_v57 = vld [vmem:[#allocation5 + $0x18] sm:$0xff] }
  0x1f   :  { %107 = vmatpush.msra.mxu0 %v72_v26  ;;  %202 = vmatpush.msra.mxu3 %v165_v37  ;;  %v161_v54 = vld [vmem:[#allocation5 + $0xa8] sm:$0xff]  ;;  %v160_v56 = vld [vmem:[#allocation5 + $0xa0] sm:$0xff]  ;;  %v142_v58 = vld [vmem:[#allocation5 + $0x10] sm:$0xff] }
  0x20   :  { %127 = vmatpush.msra.mxu1 %v73_v27  ;;  %183 = vmatpush.msra.mxu2 %v148_v40  ;;  %v159_v59 = vld [vmem:[#allocation5 + $0x98] sm:$0xff]  ;;  %v141_v60 = vld [vmem:[#allocation5 + $0x8] sm:$0xff]  ;;  %v158_v61 = vld [vmem:[#allocation5 + $0x90] sm:$0xff] }
  0x21   :  { %108 = vmatpush.msra.mxu0 %v70_v30  ;;  %203 = vmatpush.msra.mxu3 %v164_v41  ;;  %v140_v62 = vld [vmem:[#allocation5] sm:$0xff]  ;;  %v157_v63 = vld [vmem:[#allocation5 + $0x88] sm:$0xff]  ;;  %v232_v1 = vld [vmem:[%s485_s5 + $0x78] sm:$0xff] }
  0x22   :  { %128 = vmatpush.msra.mxu1 %v71_v31  ;;  %184 = vmatpush.msra.mxu2 %v147_v44  ;;  %v156_v0 = vld [vmem:[#allocation5 + $0x80] sm:$0xff]  ;;  %v231_v2 = vld [vmem:[%s485_s5 + $0x70] sm:$0xff]  ;;  %v230_v3 = vld [vmem:[%s485_s5 + $0x68] sm:$0xff] }
  0x23   :  { %109 = vmatpush.msra.mxu0 %v68_v34  ;;  %204 = vmatpush.msra.mxu3 %v163_v45  ;;  %v229_v4 = vld [vmem:[%s485_s5 + $0x60] sm:$0xff]  ;;  %v228_v5 = vld [vmem:[%s485_s5 + $0x58] sm:$0xff]  ;;  %v227_v6 = vld [vmem:[%s485_s5 + $0x50] sm:$0xff] }
  0x24   :  { %129 = vmatpush.msra.mxu1 %v69_v35  ;;  %185 = vmatpush.msra.mxu2 %v146_v48  ;;  %v226_v7 = vld [vmem:[%s485_s5 + $0x48] sm:$0xff]  ;;  %v225_v8 = vld [vmem:[%s485_s5 + $0x40] sm:$0xff]  ;;  %v224_v9 = vld [vmem:[%s485_s5 + $0x38] sm:$0xff] }
  0x25   :  { %110 = vmatpush.msra.mxu0 %v66_v38  ;;  %205 = vmatpush.msra.mxu3 %v162_v49  ;;  %v223_v10 = vld [vmem:[%s485_s5 + $0x30] sm:$0xff]  ;;  %v222_v11 = vld [vmem:[%s485_s5 + $0x28] sm:$0xff]  ;;  %v221_v12 = vld [vmem:[%s485_s5 + $0x20] sm:$0xff] }
  0x26   :  { %130 = vmatpush.msra.mxu1 %v67_v39  ;;  %186 = vmatpush.msra.mxu2 %v145_v53  ;;  %v92_v13 = vld [vmem:[%s482_s2] sm:$0x3]  ;;  %v220_v22 = vld [vmem:[%s485_s5 + $0x18] sm:$0xff]  ;;  %v219_v23 = vld [vmem:[%s485_s5 + $0x10] sm:$0xff] }
  0x27   :  { %111 = vmatpush.msra.mxu0 %v64_v42  ;;  %206 = vmatpush.msra.mxu3 %v161_v54  ;;  %v94_v14 = vperm.slane %v92_v13, 0  ;;  %v95_v15 = vperm.slane %v92_v13, 1  ;;  %v218_v24 = vld [vmem:[%s485_s5 + $0x8] sm:$0xff]  ;;  %v217_v25 = vld [vmem:[%s485_s5] sm:$0xff]  ;;  %s266_s5 = sshll.u32 %s487_s7, 4  ;;  %s267_s5 = int_to_ptr.hbm [resolvable:$true] %s266_s5 }
  0x28   :  { %131 = vmatpush.msra.mxu1 %v65_v43  ;;  %187 = vmatpush.msra.mxu2 %v144_v55  ;;  %v284_v26 = vld [vmem:[%s484_s4] ss:$0 sm:$0xff] }
  0x29   :  { %112 = vmatpush.msra.mxu0 %v62_v46  ;;  %207 = vmatpush.msra.mxu3 %v160_v56  ;;  %v285_v32 = vld [vmem:[%s486_s6] ss:$0 sm:$0xff] }
  0x2a   :  { %132 = vmatpush.msra.mxu1 %v63_v47  ;;  %188 = vmatpush.msra.mxu2 %v143_v57 }
  0x2b   :  { %113 = vmatpush.msra.mxu0 %v60_v50  ;;  %208 = vmatpush.msra.mxu3 %v159_v59 }
  0x2c   :  { %133 = vmatpush.msra.mxu1 %v61_v51  ;;  %114 = vmatmul.f32.vlgmr.msra.gmra.mxu0 %v59_v52 }
  0x2d   :  { %134 = vmatmul.f32.vlgmr.msra.gmra.mxu1 %v59_v52  ;;  %189 = vmatpush.msra.mxu2 %v142_v58 }
  0x2e   :  { %209 = vmatpush.msra.mxu3 %v158_v61  ;;  %237 = vmatpush.msrb.mxu0 %v232_v1 }
  0x2f   :  { %190 = vmatpush.msra.mxu2 %v141_v60 }
  0x30   :  { %210 = vmatpush.msra.mxu3 %v157_v63  ;;  %238 = vmatpush.msrb.mxu0 %v231_v2 }
  0x31   :  { %191 = vmatpush.msra.mxu2 %v140_v62 }
  0x32   :  { %211 = vmatpush.msra.mxu3 %v156_v0  ;;  %239 = vmatpush.msrb.mxu0 %v230_v3 }
  0x34   :  { %240 = vmatpush.msrb.mxu0 %v229_v4 }
  0x36   :  { %241 = vmatpush.msrb.mxu0 %v228_v5 }
  0x38   :  { %242 = vmatpush.msrb.mxu0 %v227_v6 }
  0x3a   :  { %243 = vmatpush.msrb.mxu0 %v226_v7 }
  0x3c   :  { %244 = vmatpush.msrb.mxu0 %v225_v8 }
  0x3e   :  { %245 = vmatpush.msrb.mxu0 %v224_v9 }
  0x40   :  { %246 = vmatpush.msrb.mxu0 %v223_v10 }
  0x42   :  { %247 = vmatpush.msrb.mxu0 %v222_v11 }
  0x44   :  { %248 = vmatpush.msrb.mxu0 %v221_v12 }
  0x46   :  { %249 = vmatpush.msrb.mxu0 %v220_v22 }
  0x48   :  { %250 = vmatpush.msrb.mxu0 %v219_v23 }
  0x4a   :  { %251 = vmatpush.msrb.mxu0 %v218_v24 }
  0x4c   :  { %252 = vmatpush.msrb.mxu0 %v217_v25 }
  0xa9   :  { %v115_v16 = vpop.f32.mrf.mxu0 }
  0xaa   :  { %v135_v17 = vpop.f32.mrf.mxu1  ;;  %v116_v18 = vadd.f32 %v115_v16, %v94_v14 }
  0xab   :  { %v136_v19 = vadd.f32 %v135_v17, %v95_v15 }
  0xac   :  { %v138_v20 = vmax.f32 %v116_v18, 0.0 }
  0xad   :  { %v139_v21 = vmax.f32 %v136_v19, 0.0 }
  0xae   :  { %192 = vmatmul.f32.vlgmr.msra.gmra.mxu2 %v138_v20 }
  0xaf   :  { %212 = vmatmul.f32.vlgmr.msra.gmra.mxu3 %v139_v21 }
 0x131   :  { %v193_v27 = vpop.f32.mrf.mxu2 }
 0x132   :  { %v213_v28 = vpop.f32.mrf.mxu3  ;;  %v194_v29 = vadd.f32 %v284_v26, %v193_v27 }
 0x134   :  { %v214_v30 = vadd.f32 %v213_v28, %v194_v29 }
 0x136   :  { %v216_v31 = vmax.f32 %v214_v30, 0.0 }
 0x138   :  { %253 = vmatmul.f32.vlgmr.msrb.gmra.mxu0 %v216_v31 }
 0x1b5   :  { %v254_v33 = vpop.f32.mrf.mxu0 }
 0x1b6   :  { %v255_v34 = vadd.f32 %v285_v32, %v254_v33 }
 0x1b8   :  { %258 = vst.msk [vmem:[#allocation7] sm:$0x3] %vm257_vm0, %v255_v34 }
 0x1b9   :  { %269 = dma.vmem_to_hbm [thread:$0]  %s265_s26, 32, %s267_s5, [#allocation4]  }
 0x1ba   :  { %362 = dma.done.wait [#allocation4], 32  }
 0x1bb   :  { %363 = vsyncadd [#allocation4], 4294967264 }
 0x1bc   :  { %274 = vsyncpa [#allocation3], 1 }
 0x1bd   :  { %275 = vsyncpa [#allocation6], 1 }
 0x1be   :  { %276 = vsyncpa [#allocation4], 1 }

</bundles_post_ra>
